<compile_context>
chip_gen: v7x
topology: tpu7x:2x2x1
jax: 0.10.0
libtpu: 0.0.40
codegen_flags: <defaults>
</compile_context>

<pallas_src>
import functools
import math

import jax
import jax.numpy as jnp
from jax import lax
from jax.experimental import pallas as pl
from jax.experimental.pallas import tpu as pltpu

_NEG_INF = -1e30          # finite "-inf": no NaN even if a row were fully masked
_MIB = 1024 * 1024


# ---------------------------------------------------------------------------
# Tile pickers
# ---------------------------------------------------------------------------
def _pick_tile(dim, cap, mult):
    """Tile <= cap: full dim if it fits, else the largest multiple of `mult`."""
    if dim <= cap:
        return dim
    return max(mult, (cap // mult) * mult)


def _pick_div_tile(dim, cap, mult):
    """Like _pick_tile, but the tile must divide `dim` exactly (reduction axes)."""
    if dim <= cap:
        return dim
    t = (cap // mult) * mult
    while t >= mult:
        if dim % t == 0:
            return t
        t -= mult
    return dim


# ---------------------------------------------------------------------------
# Tiled linear: out = x @ W + b   (W stored as (in, out)); f32 accumulation
# ---------------------------------------------------------------------------
def _linear_kernel(x_ref, w_ref, b_ref, o_ref, acc_ref):
    @pl.when(pl.program_id(2) == 0)
    def _init():
        acc_ref[...] = jnp.zeros_like(acc_ref)

    acc_ref[...] += jnp.dot(x_ref[...], w_ref[...],
                            preferred_element_type=jnp.float32)

    @pl.when(pl.program_id(2) == pl.num_programs(2) - 1)
    def _finalize():
        o_ref[...] = (acc_ref[...] + b_ref[...]).astype(o_ref.dtype)


def linear(x2, w, b, *, out_dtype=None, tm_cap=256, tn_cap=512, tk_cap=512):
    """x2: (M, Din), w: (Din, Dout), b: (Dout,) -> (M, Dout)."""
    m, d_in = x2.shape
    d_out = w.shape[1]
    out_dtype = x2.dtype if out_dtype is None else out_dtype

    tm = _pick_tile(m, tm_cap, 8)          # sublane axis: mult of 8 or full
    tn = _pick_tile(d_out, tn_cap, 128)    # lane axis: mult of 128 or full
    tk = _pick_div_tile(d_in, tk_cap, 128)  # reduction tile must divide Din
    grid_m, grid_n, grid_k = pl.cdiv(m, tm), pl.cdiv(d_out, tn), d_in // tk

    # v7x has 2 TensorCores: expose >= 2 blocks on the parallel axes when possible.
    if grid_m * grid_n == 1 and m >= 16 and m % 16 == 0:
        tm = m // 2
        grid_m = 2

    b2 = b.reshape(1, d_out).astype(jnp.float32)

    in_itm = jnp.dtype(x2.dtype).itemsize
    out_itm = jnp.dtype(out_dtype).itemsize
    vmem_bytes = (2 * (tm * tk * in_itm + tk * tn * in_itm + tn * 4
                       + tm * tn * out_itm) + tm * tn * 4)
    vmem_limit = int(min(64 * _MIB, max(32 * _MIB, 2 * vmem_bytes)))

    cost = pl.CostEstimate(
        flops=2 * m * d_in * d_out,
        transcendentals=0,
        bytes_accessed=(m * d_in + d_in * d_out) * in_itm
        + d_out * 4 + m * d_out * out_itm,
    )

    return pl.pallas_call(
        _linear_kernel,
        out_shape=jax.ShapeDtypeStruct((m, d_out), out_dtype),
        grid_spec=pltpu.PrefetchScalarGridSpec(
            num_scalar_prefetch=0,
            grid=(grid_m, grid_n, grid_k),
            in_specs=[
                pl.BlockSpec((tm, tk), lambda i, j, k: (i, k)),   # x row/K tile
                pl.BlockSpec((tk, tn), lambda i, j, k: (k, j)),   # weight tile
                pl.BlockSpec((1, tn), lambda i, j, k: (0, j)),    # bias tile
            ],
            out_specs=pl.BlockSpec((tm, tn), lambda i, j, k: (i, j)),
            scratch_shapes=[pltpu.VMEM((tm, tn), jnp.float32)],
        ),
        compiler_params=pltpu.CompilerParams(
            dimension_semantics=("parallel", "parallel", "arbitrary"),
            vmem_limit_bytes=vmem_limit),
        cost_estimate=cost,
    )(x2, w, b2)


# ---------------------------------------------------------------------------
# Causal attention, heads packed on the lane axis, flash-style over kv tiles
# ---------------------------------------------------------------------------
def _attn_kernel(q_ref, k_ref, v_ref, o_ref, m_sc, l_sc, acc_sc,
                 *, n_heads, head_dim, scale, tq, tkv):
    ki = pl.program_id(2)
    q_start = pl.program_id(1) * tq
    kv_start = ki * tkv

    @pl.when(ki == 0)
    def _init():
        m_sc[...] = jnp.full_like(m_sc, _NEG_INF)
        l_sc[...] = jnp.zeros_like(l_sc)
        acc_sc[...] = jnp.zeros_like(acc_sc)

    # Causal block skip: kv tiles fully above the diagonal do no work.
    @pl.when(kv_start <= q_start + tq - 1)
    def _compute():
        row = q_start + lax.broadcasted_iota(jnp.int32, (tq, tkv), 0)
        col = kv_start + lax.broadcasted_iota(jnp.int32, (tq, tkv), 1)
        masked = col > row
        q = q_ref[0]                      # (tq, D), heads packed on lanes
        k = k_ref[0]                      # (tkv, D)
        v = v_ref[0]                      # (tkv, D)
        for h in range(n_heads):          # static unrolled per-head loop
            sl = slice(h * head_dim, (h + 1) * head_dim)
            # q_h . k_h^T via dot_general (transpose folded into operand feed)
            s = lax.dot_general(q[:, sl], k[:, sl], (((1,), (1,)), ((), ())),
                                preferred_element_type=jnp.float32)
            s = jnp.where(masked, _NEG_INF, s * scale)
            m_prev = m_sc[h]                                   # (tq, 1)
            m_new = jnp.maximum(m_prev, jnp.max(s, axis=-1, keepdims=True))
            alpha = jnp.exp(m_prev - m_new)
            p = jnp.exp(s - m_new)
            l_sc[h] = alpha * l_sc[h] + jnp.sum(p, axis=-1, keepdims=True)
            acc_sc[:, sl] = alpha * acc_sc[:, sl] + jnp.dot(
                p.astype(v.dtype), v[:, sl], preferred_element_type=jnp.float32)
            m_sc[h] = m_new

    @pl.when(ki == pl.num_programs(2) - 1)
    def _finalize():
        # Normalization via approximate reciprocal (EUP slot, not VALU divide).
        for h in range(n_heads):
            sl = slice(h * head_dim, (h + 1) * head_dim)
            inv = pl.reciprocal(l_sc[h], approx=True)          # (tq, 1)
            o_ref[0, :, sl] = (acc_sc[:, sl] * inv).astype(o_ref.dtype)
        # TODO(synk): attention dropout (p=0.1) is a no-op in eval mode; omitted.


def attention(q, k, v, n_heads, *, tq_cap=256, tkv_cap=256):
    """q, k, v: (B, S, D) with heads packed on the last axis -> (B, S, D)."""
    b, s, d = q.shape
    assert d % n_heads == 0
    hd = d // n_heads
    scale = 1.0 / math.sqrt(hd)

    tq = _pick_tile(s, tq_cap, 8)
    tkv = _pick_tile(s, tkv_cap, 8)
    n_q, n_kv = pl.cdiv(s, tq), pl.cdiv(s, tkv)

    q_spec = pl.BlockSpec((1, tq, d), lambda bi, qi, ki: (bi, qi, 0))
    kv_spec = pl.BlockSpec((1, tkv, d), lambda bi, qi, ki: (bi, ki, 0))
    o_spec = pl.BlockSpec((1, tq, d), lambda bi, qi, ki: (bi, qi, 0))

    itm = jnp.dtype(q.dtype).itemsize
    vmem_bytes = (2 * (2 * tq * d + 2 * tkv * d) * itm
                  + (tq * d + 2 * n_heads * tq * 128) * 4)
    vmem_limit = int(min(64 * _MIB, max(32 * _MIB, 2 * vmem_bytes)))

    cost = pl.CostEstimate(
        flops=4 * b * n_heads * s * s * hd,
        transcendentals=b * n_heads * s * s,
        bytes_accessed=4 * b * s * d * itm,
    )

    kernel = functools.partial(_attn_kernel, n_heads=n_heads, head_dim=hd,
                               scale=scale, tq=tq, tkv=tkv)
    return pl.pallas_call(
        kernel,
        out_shape=jax.ShapeDtypeStruct((b, s, d), q.dtype),
        grid_spec=pltpu.PrefetchScalarGridSpec(
            num_scalar_prefetch=0,
            grid=(b, n_q, n_kv),
            in_specs=[q_spec, kv_spec, kv_spec],
            out_specs=o_spec,
            scratch_shapes=[
                pltpu.VMEM((n_heads, tq, 1), jnp.float32),   # running max
                pltpu.VMEM((n_heads, tq, 1), jnp.float32),   # running sum
                pltpu.VMEM((tq, d), jnp.float32),            # output accumulator
            ],
        ),
        compiler_params=pltpu.CompilerParams(
            dimension_semantics=("parallel", "parallel", "arbitrary"),
            vmem_limit_bytes=vmem_limit),
        cost_estimate=cost,
    )(q, k, v)


# ---------------------------------------------------------------------------
# Full MultiHeadAttention forward
# ---------------------------------------------------------------------------
def fuse_qkv_weights(wq, wk, wv):
    """Build the fused (D, 3D) QKV weight ONCE at init (hoisted out of forward)."""
    return jnp.concatenate([wq, wk, wv], axis=1)


def mha_forward(x, wqkv, wo, bo, n_heads, *, compute_dtype=None):
    """x: (B, S, D); wqkv: (D, 3D) fused; wo: (D, D); bo: (D,). Weights (in, out)."""
    b, s, d = x.shape
    m = b * s
    cdt = x.dtype if compute_dtype is None else compute_dtype

    x2 = x.reshape(m, d).astype(cdt)
    qkv = linear(x2, wqkv.astype(cdt), jnp.zeros((3 * d,), jnp.float32),
                 out_dtype=cdt)                                  # (M, 3D)
    q, k, v = jnp.split(qkv, 3, axis=1)                          # (M, D) each

    # No (B, H, S, hd) transposes: heads stay packed on the lane axis end-to-end.
    ctx = attention(q.reshape(b, s, d), k.reshape(b, s, d), v.reshape(b, s, d),
                    n_heads)                                     # (B, S, D)

    out = linear(ctx.reshape(m, d).astype(cdt), wo.astype(cdt),
                 bo.astype(jnp.float32), out_dtype=x.dtype)      # output proj + bias
    return out.reshape(b, s, d)


# ---------------------------------------------------------------------------
# Pure-JAX reference (mirrors the PyTorch forward in eval mode)
# ---------------------------------------------------------------------------
def ref_mha(x, wq, wk, wv, wo, bo, n_heads):
    b, s, d = x.shape
    hd = d // n_heads

    def to_heads(t):
        return t.reshape(b, s, n_heads, hd).transpose(0, 2, 1, 3)

    qh, kh, vh = to_heads(x @ wq), to_heads(x @ wk), to_heads(x @ wv)
    scores = jnp.einsum("bhqd,bhkd->bhqk", qh, kh)
    mask = jnp.triu(jnp.ones((s, s), dtype=bool), 1)
    scores = jnp.where(mask, -jnp.inf, scores) / (hd ** 0.5)
    w = jax.nn.softmax(scores, axis=-1)
    ctx = jnp.einsum("bhqk,bhkd->bhqd", w, vh)
    ctx = ctx.transpose(0, 2, 1, 3).reshape(b, s, d)
    return (ctx @ wo + bo).reshape(b, s, d)


if __name__ == "__main__":
    B, S, D, H = 2, 8, 32, 4      # small shapes; head_dim = 8

    key = jax.random.PRNGKey(0)
    kx, kq, kk, kv, ko, kb = jax.random.split(key, 6)
    bound = 1.0 / math.sqrt(D)

    x = jax.random.normal(kx, (B, S, D), dtype=jnp.float32)
    wq = jax.random.uniform(kq, (D, D), minval=-bound, maxval=bound, dtype=jnp.float32)
    wk = jax.random.uniform(kk, (D, D), minval=-bound, maxval=bound, dtype=jnp.float32)
    wv = jax.random.uniform(kv, (D, D), minval=-bound, maxval=bound, dtype=jnp.float32)
    wo = jax.random.uniform(ko, (D, D), minval=-bound, maxval=bound, dtype=jnp.float32)
    bo = jax.random.uniform(kb, (D,), minval=-bound, maxval=bound, dtype=jnp.float32)

    # Init-time weight fusion (hoisted out of the per-call path).
    wqkv = fuse_qkv_weights(wq, wk, wv)
    ref = ref_mha(x, wq, wk, wv, wo, bo, H)

    # f32 path (matches reference; approx-reciprocal softmax normalization).
    out = jax.block_until_ready(mha_forward(x, wqkv, wo, bo, H))
    err = float(jnp.max(jnp.abs(out - ref)))
    assert jnp.allclose(out, ref, atol=5e-3, rtol=5e-3), f"f32 max abs err = {err}"

    # bf16 matmul-input path (f32 accumulation / softmax math), per v6e/v7x advice.
    out_bf16 = jax.block_until_ready(
        mha_forward(x, wqkv, wo, bo, H, compute_dtype=jnp.bfloat16))
    err_bf16 = float(jnp.max(jnp.abs(out_bf16 - ref)))
    assert jnp.allclose(out_bf16, ref, atol=8e-2, rtol=8e-2), \
        f"bf16 max abs err = {err_bf16}"

    print("KERNEL_OK")
</pallas_src>

<mosaic_0001>
module attributes {stable_mosaic.version = 11 : i64} {
  func.func @_linear_kernel(%arg0: i32, %arg1: i32, %arg2: i32, %arg3: memref<8x32xf32, #tpu.memory_space<vmem>>, %arg4: memref<32x96xf32, #tpu.memory_space<vmem>>, %arg5: memref<1x96xf32, #tpu.memory_space<vmem>>, %arg6: memref<8x96xf32, #tpu.memory_space<vmem>>, %arg7: memref<8x96xf32, #tpu.memory_space<vmem>>) attributes {dimension_semantics = [#tpu.dimension_semantics<parallel>, #tpu.dimension_semantics<parallel>, #tpu.dimension_semantics<arbitrary>], iteration_bounds = array<i64: 2, 1, 1>, scalar_prefetch = 0 : i64, scratch_operands = 1 : i64, tpu.core_type = #tpu.core_type<tc>, window_params = [{transform_indices = @transform_0, window_bounds = array<i64: 8, 32>}, {transform_indices = @transform_1, window_bounds = array<i64: 32, 96>}, {transform_indices = @transform_2, window_bounds = array<i64: 1, 96>}, {transform_indices = @transform_3, window_bounds = array<i64: 8, 96>}]} {
    %c0_i32 = arith.constant 0 : i32
    %0 = arith.cmpi eq, %arg2, %c0_i32 : i32
    %1 = arith.extui %0 : i1 to i32
    %c0_i32_0 = arith.constant 0 : i32
    %2 = arith.cmpi ne, %1, %c0_i32_0 : i32
    scf.if %2 {
      %cst_10 = arith.constant 0.000000e+00 : f32
      %12 = vector.broadcast %cst_10 : f32 to vector<8x96xf32>
      %c0_11 = arith.constant 0 : index
      %c0_12 = arith.constant 0 : index
      %13 = vector.load %arg7[%c0_11, %c0_12] : memref<8x96xf32, #tpu.memory_space<vmem>>, vector<8x96xf32>
      tpu.vector_store %arg7[%c0_11, %c0_12], %12 {strides = array<i32>} : memref<8x96xf32, #tpu.memory_space<vmem>>, vector<8x96xf32>,
    } else {
    }
    %c0 = arith.constant 0 : index
    %c0_1 = arith.constant 0 : index
    %3 = vector.load %arg7[%c0, %c0_1] : memref<8x96xf32, #tpu.memory_space<vmem>>, vector<8x96xf32>
    %c0_2 = arith.constant 0 : index
    %c0_3 = arith.constant 0 : index
    %4 = vector.load %arg3[%c0_2, %c0_3] : memref<8x32xf32, #tpu.memory_space<vmem>>, vector<8x32xf32>
    %c0_4 = arith.constant 0 : index
    %c0_5 = arith.constant 0 : index
    %5 = vector.load %arg4[%c0_4, %c0_5] : memref<32x96xf32, #tpu.memory_space<vmem>>, vector<32x96xf32>
    %cst = arith.constant dense<0.000000e+00> : vector<8x96xf32>
    %6 = tpu.matmul %4, %5, %cst {dimension_numbers = #tpu.dot_dimension_numbers<[1], [0], [0], [1], [0, 0, 1, 1], [], []>} : vector<8x32xf32>, vector<32x96xf32>, vector<8x96xf32> -> vector<8x96xf32>
    %7 = arith.addf %3, %6 : vector<8x96xf32>
    %c0_6 = arith.constant 0 : index
    %c0_7 = arith.constant 0 : index
    %8 = vector.load %arg7[%c0_6, %c0_7] : memref<8x96xf32, #tpu.memory_space<vmem>>, vector<8x96xf32>
    tpu.vector_store %arg7[%c0_6, %c0_7], %7 {strides = array<i32>} : memref<8x96xf32, #tpu.memory_space<vmem>>, vector<8x96xf32>,
    %c0_i32_8 = arith.constant 0 : i32
    %9 = arith.cmpi eq, %arg2, %c0_i32_8 : i32
    %10 = arith.extui %9 : i1 to i32
    %c0_i32_9 = arith.constant 0 : i32
    %11 = arith.cmpi ne, %10, %c0_i32_9 : i32
    scf.if %11 {
      %c0_10 = arith.constant 0 : index
      %c0_11 = arith.constant 0 : index
      %12 = vector.load %arg7[%c0_10, %c0_11] : memref<8x96xf32, #tpu.memory_space<vmem>>, vector<8x96xf32>
      %c0_12 = arith.constant 0 : index
      %c0_13 = arith.constant 0 : index
      %13 = vector.load %arg5[%c0_12, %c0_13] : memref<1x96xf32, #tpu.memory_space<vmem>>, vector<1x96xf32>
      %14 = vector.broadcast %13 : vector<1x96xf32> to vector<8x96xf32>
      %15 = arith.addf %12, %14 : vector<8x96xf32>
      %c0_14 = arith.constant 0 : index
      %c0_15 = arith.constant 0 : index
      %16 = vector.load %arg6[%c0_14, %c0_15] : memref<8x96xf32, #tpu.memory_space<vmem>>, vector<8x96xf32>
      tpu.vector_store %arg6[%c0_14, %c0_15], %15 {strides = array<i32>} : memref<8x96xf32, #tpu.memory_space<vmem>>, vector<8x96xf32>,
    } else {
    }
    return
  }
  func.func @transform_0(%arg0: i32, %arg1: i32, %arg2: i32) -> (i32, i32) {
    %c0_i32 = arith.constant 0 : i32
    return %arg0, %arg2 : i32, i32
  }
  func.func @transform_1(%arg0: i32, %arg1: i32, %arg2: i32) -> (i32, i32) {
    %c0_i32 = arith.constant 0 : i32
    return %arg2, %arg1 : i32, i32
  }
  func.func @transform_2(%arg0: i32, %arg1: i32, %arg2: i32) -> (i32, i32) {
    %c0_i32 = arith.constant 0 : i32
    %c0_i32_0 = arith.constant 0 : i32
    return %c0_i32, %arg1 : i32, i32
  }
  func.func @transform_3(%arg0: i32, %arg1: i32, %arg2: i32) -> (i32, i32) {
    %c0_i32 = arith.constant 0 : i32
    return %arg0, %arg1 : i32, i32
  }
}

</mosaic_0001>

<bundles_post_ra>
// kernel: tpu_custom_call.1
= control target key start
LH: loop header
LB: loop body
LE: loop exit
PB: predicated region body
PF: predicated region fallthrough
CT: control target
= control target key end

     0   :  { %8 = vsyncpa [#allocation4], 0  ;;  %s993_s0 = inlined_call_operand.hbm [shape: f32[16,32], index: 0, kind: input, shape index: {}]   ;;  %s994_s1 = inlined_call_operand.hbm [shape: f32[32,96], index: 1, kind: input, shape index: {}]   ;;  %s995_s2 = inlined_call_operand.vmem [shape: f32[1,96], index: 2, kind: input, shape index: {}]   ;;  %s996_s3 = inlined_call_operand.hbm [shape: f32[16,96], index: 3, kind: output, shape index: {}]  }
   0x1   :  { %10 = vsyncpa [#allocation4 + $0x1], 0 }
   0x2   :  { %11 = vsyncpa [#allocation7], 0 }
   0x3   :  { %12 = vsyncpa [#allocation5], 0 }
   0x4   :  { %14 = vsyncpa [#allocation5 + $0x1], 0  ;;  %s769_s12 = smov 0   ;;  %s771_s13 = smov 0  }
   0x5   :  { %s773_s14 = smov 0   ;;  %s775_s15 = smov 0  }
   0x6   :  { %s777_s16 = smov 0   ;;  %s779_s17 = smov 0  }
   0x7 LB: > { %s477_s18 = sadd.s32 4294967295, %s739_s17   ;;  %s478_s19 = sadd.s32 4294967294, %s739_s17   ;;  %s739_s17 = sphi %s779_s17, %s20_s17   ;;  %s735_s16 = sphi %s777_s16, %s1020_s16   ;;  %s731_s15 = sphi %s775_s15, %s1019_s15   ;;  %s727_s14 = sphi %s773_s14, %s1018_s14   ;;  %s723_s13 = sphi %s771_s13, %s1017_s13   ;;  %s719_s12 = sphi %s769_s12, %s1016_s12  }
   0x8   : > { %p61_p0 = scmp.ne.s32.totalorder %s723_s13, %s719_s12  ;;  %p803_p1 = scmp.eq.s32.totalorder %s477_s18, 0 }
   0x9   : > { %p807_p2 = scmp.eq.s32.totalorder %s477_s18, 1  ;;  %p147_p3 = scmp.eq.s32.totalorder %s478_s19, 1 }
   0xa   : > { %s1001_s20 = scalar_select %p803_p1, 1, 0 }
   0xb   : > { %s1002_s21 = scalar_select %p807_p2, 1, 0 }
   0xc   : > { %p813_p4 = por %p803_p1, %p61_p0  ;;  %p479_p5 = scmp.ge.s32.totalorder %s739_s17, 1 }
   0xd   : > { %p818_p6 = por %p147_p3, %p61_p0  ;;  %p154_p7 = scmp.lt.s32.totalorder %s739_s17, 3 }
   0xe   : > { %s1003_s22 = scalar_select %p813_p4, 1, 0 }
   0xf   : > { %s1004_s23 = scalar_select %p818_p6, 1, 0 }
  0x10   : > { %p823_p8 = pnand %p479_p5, %p154_p7  ;;  %s741_s25 = smov [#allocation6]  }
  0x11   : > { %s170_s26 = sshll.u32 %s741_s25, 4  ;;  %s39_s28 = sadd.s32 1, %s735_s16  ;;  %s171_s26 = int_to_ptr.vmem [resolvable:$true] %s170_s26 }
  0x12   : > { %s1005_s24 = scalar_select %p823_p8, 1, 0 }
  0x13   : > { %p525_p9 = pneg %p823_p8  ;;  %s595_s4 = scalar_lea.hbm %s994_s1, 512 }
  0x14   : > { %p596_p12 = scmp.ne.s32.totalorder %s994_s1, %s595_s4  ;;  %p602_p5 = scmp.lt.u32.totalorder %s595_s4, %s994_s1 }
  0x15   : > { %p832_p11 = pnand %p525_p9, %p803_p1 }
  0x17   : > { %p597_p13 = pneg %p832_p11 }
  0x19   : > { %p598_p0 = pnand %p597_p13, %p596_p12 }
  0x1b   : > { %p599_p3 = pneg %p598_p0 }
  0x1d   : > { %p604_p7 = pnand %p602_p5, %p599_p3 }
  0x1f   : > { %607 = shalt.err (!%p604_p7)
}
  0x20   : > { %s608_s9 = scalar_lea.vmem %s171_s26, 512  ;;  %p616_p1 = scmp.lt.s32.totalorder %s171_s26, %s171_s26 }
  0x21   : > { %p609_p9 = scmp.ne.s32.totalorder %s171_s26, %s608_s9  ;;  %p617_p4 = scmp.lt.s32.totalorder %s608_s9, %s608_s9 }
  0x23   : > { %p611_p10 = pnand %p609_p9, %p597_p13  ;;  %p618_p8 = por %p617_p4, %p616_p1 }
  0x25   : > { %p612_p6 = pneg %p611_p10 }
  0x27   : > { %p619_p2 = pnand %p618_p8, %p612_p6 }
  0x29   : > { %622 = shalt.err (!%p619_p2)
}
  0x2a   : > { %s742_s10 = smov 128   ;;  %s743_s11 = smov 8  }
  0x2b   : > { %528 = dma.hbm_to_vmem [thread:$0]  (!%p832_p11), %s994_s1, 512, %s171_s26, [#allocation7], %s742_s10, %s742_s10, %s743_s11  }
  0x2c   : > { %p41_p1 = scmp.ge.s32.totalorder %s39_s28, 2  ;;  %s48_s25 = sadd.s32 1, %s727_s14 }
  0x2d   : > { %p55_p2 = scmp.ne.s32.totalorder %s727_s14, %s723_s13  ;;  %p56_p4 = scmp.eq.s32.totalorder %s739_s17, 0 }
  0x2e   : > { %s1022_s28 = smov (%p41_p1, %s39_s28), 0  ;;  %p1008_p8 = scmp.ne.s32.totalorder %s1002_s21, 0 }
  0x2f   : > { %p859_p6 = por %p56_p4, %p55_p2  ;;  %s43_s27 = ssub.s32 %s735_s16, %s1022_s28 }
  0x30   : > { %p865_p10 = por %p1008_p8, %p55_p2  ;;  %p538_p12 = scmp.lt.s32.totalorder %s739_s17, 2 }
  0x31   : > { %p46_p11 = scmp.eq.s32.totalorder %s43_s27, 0  ;;  %s190_s26 = sand.u32 1, %s727_s14  }
  0x32   : > { %s483_s4 = sshll.u32 %s190_s26, 3  ;;  %s484_s6 = sshll.u32 %s735_s16, 7 }
  0x33   : > { %s874_s5 = scalar_select %p46_p11, %s727_s14, %s48_s25  }
  0x34   : > { %s880_s9 = scalar_lea.hbm %s993_s0, %s484_s6  ;;  %s194_s21 = scalar_lea.vmem [#allocation3], %s483_s4 }
  0x35   : > { %s202_s10 = sshll.u32 %s194_s21, 4  ;;  %p886_p13 = pnand %p538_p12, %p859_p6  ;;  %s882_s10 = int_to_ptr.vmem [resolvable:$true] %s202_s10 }
  0x36   : > { %s191_s18 = scalar_lea.sflag [#allocation4], %s190_s26  ;;  %s623_s19 = scalar_lea.hbm %s880_s9, 128 }
  0x37   : > { %p624_p0 = scmp.ne.s32.totalorder %s880_s9, %s623_s19  ;;  %p625_p3 = pneg %p886_p13 }
  0x38   : > { %s628_s4 = scalar_lea.hbm %s993_s0, 256  ;;  %p629_p9 = scmp.lt.u32.totalorder %s880_s9, %s993_s0 }
  0x39   : > { %p626_p5 = pnand %p625_p3, %p624_p0  ;;  %p630_p1 = scmp.lt.u32.totalorder %s628_s4, %s623_s19 }
  0x3a   : > { %p632_p4 = scmp.lt.u32.totalorder %s623_s19, %s880_s9 }
  0x3b   : > { %p627_p7 = pneg %p626_p5  ;;  %p631_p2 = por %p630_p1, %p629_p9 }
  0x3d   : > { %p633_p6 = por %p632_p4, %p631_p2 }
  0x3f   : > { %p634_p8 = pnand %p633_p6, %p627_p7 }
  0x41   : > { %637 = shalt.err (!%p634_p8)
}
  0x42   : > { %s638_s26 = scalar_lea.vmem %s882_s10, 128  ;;  %s744_s7 = smov [#allocation3]  }
  0x43   : > { %p639_p12 = scmp.ne.s32.totalorder %s882_s10, %s638_s26  ;;  %s643_s8 = sshll.u32 %s744_s7, 4  ;;  %s644_s8 = int_to_ptr.vmem [resolvable:$false] %s643_s8 }
  0x44   : > { %s645_s21 = scalar_lea.vmem %s644_s8, 256  ;;  %p646_p5 = scmp.lt.s32.totalorder %s882_s10, %s644_s8 }
  0x45   : > { %p641_p11 = pnand %p639_p12, %p625_p3  ;;  %p647_p9 = scmp.lt.s32.totalorder %s645_s21, %s638_s26 }
  0x47   : > { %p642_p0 = pneg %p641_p11  ;;  %p648_p1 = por %p647_p9, %p646_p5 }
  0x49   : > { %p649_p2 = pnand %p648_p1, %p642_p0 }
  0x4b   : > { %652 = shalt.err (!%p649_p2)
}
  0x4c   : > { %532 = dma.hbm_to_vmem [thread:$0]  (!%p886_p13), %s880_s9, 128, %s882_s10, %s191_s18  }
  0x4d   : > { %p1011_p7 = scmp.ne.s32.totalorder %s1005_s24, 0 }
  0x4e   : > { %s918_s19 = sand.u32 (!%p1011_p7), 1, %s723_s13   ;;  %p1012_p3 = scmp.ne.s32.totalorder (!%p1011_p7), %s1003_s22, 0 }
  0x4f   : > { %211 = sbr.rel (%p1011_p7) target bundleno = 339 (0x153), region = 32  ;;  %s486_s25 = sshll.u32 (!%p1011_p7), %s918_s19, 3 }
  0x50   : > { %s214_s27 = scalar_lea.sflag (!%p1011_p7), [#allocation4], %s918_s19  ;;  %s217_s4 = scalar_lea.vmem (!%p1011_p7), [#allocation3], %s486_s25 }
  0x56   : > { %706 = dma.done.wait (%p1012_p3), %s214_s27, 128  }
  0x57   : > { %708 = vsyncadd (%p1012_p3), %s214_s27, 4294967168  ;;  %p1013_p13 = scmp.ne.s32.totalorder %s1001_s20, 0 }
  0x59   : > { %710 = dma.done.wait (%p1013_p13), [#allocation7], 512  }
  0x5a   : > { %712 = vsyncadd (%p1013_p13), [#allocation7], 4294966784  ;;  %vm255_vm0 = vcmask 785408   ;;  %v745_v0 = vmov 0.0|0.0   ;;  %v746_v1 = vmov 0.0   ;;  %vm747_vm1 = vmmov 0  }
  0x5b   : > { %511 = vmatprep.subr.bf16.mxu0 %v745_v0  ;;  %256 = vst.msk [vmem:[#allocation2] sm:$0xff] %vm255_vm0, %v746_v1  ;;  %508 = vmatprep.mubr.msk.f32.mxu0 %vm747_vm1, %v746_v1  ;;  %v259_v2 = vld [vmem:[#allocation6] sm:$0xff]  ;;  %v260_v3 = vld [vmem:[#allocation6 + $0x8] sm:$0xff]  ;;  %v261_v4 = vld [vmem:[#allocation6 + $0x10] sm:$0xff]  ;;  %vm263_vm2 = vcmask 261120   ;;  %s492_s24 = sshll.u32 %s731_s15, 7 }
  0x5c   : > { %v512_v5 = vpack.c.bf16 %v260_v3, %v259_v2  ;;  %v262_v6 = vld [vmem:[#allocation6 + $0x18] sm:$0xff]  ;;  %v490_v13 = vld [vmem:[%s995_s2] ss:$0 sm:$0xff]  ;;  %s246_s9 = scalar_lea.vmem [#allocation8], %s486_s25  ;;  %s943_s29 = scalar_lea.hbm %s996_s3, %s492_s24 }
  0x5d   : > { %v515_v7 = vpack.c.bf16 %v262_v6, %v261_v4  ;;  %v258_v8 = vld [vmem:[%s217_s4] sm:$0xff]  ;;  %s368_s10 = sshll.u32 %s246_s9, 4  ;;  %s354_s6 = scalar_lea.sflag [#allocation5], %s918_s19  ;;  %s945_s10 = int_to_ptr.vmem [resolvable:$true] %s368_s10 }
  0x5e   : > { %513 = vmatpush3.bf16.msra.mxu0 %v512_v5  ;;  %s653_s26 = scalar_lea.vmem %s945_s10, 128  ;;  %s748_s15 = smov [#allocation8]  }
  0x5f   : > { %514 = vmatprep.subr.bf16.mxu0 %v745_v0  ;;  %p654_p4 = scmp.ne.s32.totalorder %s945_s10, %s653_s26  ;;  %s657_s7 = sshll.u32 %s748_s15, 4  ;;  %s658_s7 = int_to_ptr.vmem [resolvable:$false] %s657_s7 }
  0x60   : > { %s659_s8 = scalar_lea.vmem %s658_s7, 256  ;;  %p660_p12 = scmp.lt.s32.totalorder %s945_s10, %s658_s7 }
  0x61   : > { %p655_p6 = pnand %p654_p4, %p865_p10  ;;  %p661_p11 = scmp.lt.s32.totalorder %s659_s8, %s653_s26 }
  0x62   : > { %516 = vmatpush3.bf16.msra.mxu0 %v515_v7  ;;  %v257_v9 = vld [vmem:[#allocation2] sm:$0xff] }
  0x63   : > { %p656_p8 = pneg %p655_p6  ;;  %p662_p0 = por %p661_p11, %p660_p12 }
  0x65   : > { %509 = vmatmul.mubr.msk.f32.vlgmr.msra.gmra.mrb[0].mxu0 %vm263_vm2, %v258_v8  ;;  %p663_p5 = pnand %p662_p0, %p656_p8 }
 0x138   : > { %v333_v10 = vpop.f32.mrb[0].mxu0 }
 0x139   : > { %v337_v11 = vadd.f32 %v333_v10, %v257_v9  ;;  %v510_v12 = vpop.f32.mrb[1].mxu0 }
 0x13b   : > { %339 = vst.msk [vmem:[#allocation2] sm:$0xff] %vm255_vm0, %v337_v11 }
 0x142   : > { %v343_v14 = vld [vmem:[#allocation2] sm:$0xff] }
 0x143   : > { %v351_v15 = vadd.f32 %v490_v13, %v343_v14 }
 0x145   : > { %352 = vst.msk [vmem:[%s246_s9] sm:$0xff] %vm255_vm0, %v351_v15 }
 0x146   : > { %666 = shalt.err (!%p663_p5)
}
 0x147   : > { %s667_s21 = scalar_lea.hbm %s943_s29, 128  ;;  %s671_s27 = scalar_lea.hbm %s996_s3, 256 }
 0x148   : > { %p668_p9 = scmp.ne.s32.totalorder %s943_s29, %s667_s21  ;;  %p672_p7 = scmp.lt.u32.totalorder %s943_s29, %s996_s3 }
 0x149   : > { %p673_p3 = scmp.lt.u32.totalorder %s671_s27, %s667_s21  ;;  %p675_p4 = scmp.lt.u32.totalorder %s667_s21, %s943_s29 }
 0x14a   : > { %p669_p1 = pnand %p668_p9, %p865_p10 }
 0x14b   : > { %p674_p13 = por %p673_p3, %p672_p7 }
 0x14c   : > { %p670_p2 = pneg %p669_p1 }
 0x14d   : > { %p676_p6 = por %p675_p4, %p674_p13 }
 0x14f   : > { %p677_p8 = pnand %p676_p6, %p670_p2 }
 0x151   : > { %680 = shalt.err (!%p677_p8)
}
 0x152   : > { %523 = dma.vmem_to_hbm [thread:$0]  (%p865_p10), %s945_s10, 128, %s943_s29, %s354_s6  }
 0x153 PF: > { %s380_s22 = sand.u32 1, %s719_s12   ;;  %p1014_p12 = scmp.ne.s32.totalorder %s1004_s23, 0 }
 0x154   : > { %p1015_p11 = scmp.ge.s32.totalorder %s739_s17, 2  ;;  %s381_s24 = scalar_lea.sflag [#allocation5], %s380_s22 }
 0x156   : > { %p534_p0 = pnand %p1015_p11, %p1014_p12 }
 0x158   : > { %714 = dma.done.wait (!%p534_p0), %s381_s24, 128  }
 0x159   : > { %716 = vsyncadd (!%p534_p0), %s381_s24, 4294967168  ;;  %s20_s17 = sadd.s32 1, %s739_s17   ;;  %s1016_s12 = smov %s723_s13 }
 0x15a   : > { %p17_p5 = scmp.ge.s32.totalorder %s20_s17, 4   ;;  %s1017_s13 = smov %s727_s14 }
 0x15b   : > { %s1018_s14 = smov %s874_s5  ;;  %s1019_s15 = smov %s735_s16 }
 0x15c   : > { %s1020_s16 = smov %s1022_s28  ;;  %19 = sbr.rel (!%p17_p5) target bundleno = 7 (0x7), region = 93 }
 0x163   :  { %386 = vsyncpa [#allocation4], 1 }
 0x164   :  { %388 = vsyncpa [#allocation4 + $0x1], 1 }
 0x165   :  { %389 = vsyncpa [#allocation7], 1 }
 0x166   :  { %390 = vsyncpa [#allocation5], 1 }
 0x167   :  { %392 = vsyncpa [#allocation5 + $0x1], 1 }

</bundles_post_ra>
